<compile_context>
chip_gen: v7x
topology: tpu7x:2x2x1
jax: 0.10.0
libtpu: 0.0.40
codegen_flags: <defaults>
</compile_context>

<pallas_src>
import functools

import jax
import jax.numpy as jnp
from jax.experimental import pallas as pl
from jax.experimental.pallas import tpu as pltpu

SUBLANE = 8


def _round_up(x: int, m: int) -> int:
    return ((x + m - 1) // m) * m


def policy_mlp_kernel(x_ref, w1_ref, b1_ref, w2_ref, b2_ref, w3_ref, b3_ref, o_ref):
    # x_ref: (tb, in_dim) f32. Weights already in compute dtype (bf16 or f32),
    # shaped (in, out) so the kernel computes x @ W + b (== PyTorch x @ W.T + b).
    x = x_ref[...]

    # fc1 + ReLU: bf16 MXU inputs, f32 accumulate; bias add + ReLU in f32 (VPU),
    # downcast fused into the activation for the next MXU dot.
    h1 = jnp.dot(x.astype(w1_ref.dtype), w1_ref[...],
                 preferred_element_type=jnp.float32) + b1_ref[...]
    h1 = jnp.maximum(h1, 0.0).astype(w2_ref.dtype)

    # fc2 + ReLU
    h2 = jnp.dot(h1, w2_ref[...],
                 preferred_element_type=jnp.float32) + b2_ref[...]
    h2 = jnp.maximum(h2, 0.0).astype(w3_ref.dtype)

    # fc3 (logits, no activation) — narrow (tb, n_actions) store, no lane padding.
    o = jnp.dot(h2, w3_ref[...],
                preferred_element_type=jnp.float32) + b3_ref[...]
    o_ref[...] = o.astype(o_ref.dtype)


def prepare_params(w1, b1, w2, b2, w3, b3, compute_dtype=jnp.bfloat16):
    """One-time param prep (hoisted out of the per-call path): cast weights to
    the MXU compute dtype, keep biases in f32. Weights are (in, out)."""
    f32 = jnp.float32
    return (w1.astype(compute_dtype), b1.astype(f32),
            w2.astype(compute_dtype), b2.astype(f32),
            w3.astype(compute_dtype), b3.astype(f32))


@functools.partial(jax.jit, static_argnames=("block_batch",))
def policy_network_forward(x, w1, b1, w2, b2, w3, b3, *, block_batch=1024):
    """x: (B, input_dim). w*: (in, out) in compute dtype. b*: (1, out) f32.
    Returns (B, n_actions) f32 logits."""
    B, in_dim = x.shape
    h1_dim = w1.shape[1]
    h2_dim = w2.shape[1]
    n_actions = w3.shape[1]

    if B == 0:  # degenerate batch
        return jnp.zeros((0, n_actions), jnp.float32)

    # --- adaptive batch tiling (all static Python on trace-time shapes) ---
    block_batch = max(SUBLANE, _round_up(int(block_batch), SUBLANE))
    n_tiles = pl.cdiv(B, block_batch)
    # v7x megacore: guarantee >= 2 grid steps when the batch is big enough to
    # split, so ("parallel",) shards rows across both TensorCores. Harmless
    # (one extra tiny step) on single-TC v5e/v6e.
    if n_tiles < 2 and B >= 4 * SUBLANE:
        n_tiles = 2
    tb = _round_up(pl.cdiv(B, n_tiles), SUBLANE)   # always a sublane multiple
    b_p = n_tiles * tb                             # only row padding, no lane padding

    x32 = x.astype(jnp.float32)
    if b_p != B:
        x32 = jnp.pad(x32, ((0, b_p - B), (0, 0)))

    f32 = jnp.float32
    b1f, b2f, b3f = b1.astype(f32), b2.astype(f32), b3.astype(f32)

    # Advisory cost hint for XLA's scheduler.
    flops = 2 * b_p * (in_dim * h1_dim + h1_dim * h2_dim + h2_dim * n_actions)
    param_bytes = sum(int(a.size) * a.dtype.itemsize
                      for a in (w1, b1f, w2, b2f, w3, b3f))
    bytes_accessed = int(b_p * in_dim * 4 + b_p * n_actions * 4 + param_bytes)

    resident = lambda i: (0, 0)  # weights/biases: same block every step -> stay in VMEM

    out = pl.pallas_call(
        policy_mlp_kernel,
        out_shape=jax.ShapeDtypeStruct((b_p, n_actions), jnp.float32),
        grid=(n_tiles,),
        in_specs=[
            pl.BlockSpec((tb, in_dim), lambda i: (i, 0)),   # x: batch-tiled, real width
            pl.BlockSpec((in_dim, h1_dim), resident),       # w1
            pl.BlockSpec((1, h1_dim), resident),            # b1
            pl.BlockSpec((h1_dim, h2_dim), resident),       # w2
            pl.BlockSpec((1, h2_dim), resident),            # b2
            pl.BlockSpec((h2_dim, n_actions), resident),    # w3
            pl.BlockSpec((1, n_actions), resident),         # b3
        ],
        out_specs=pl.BlockSpec((tb, n_actions), lambda i: (i, 0)),
        compiler_params=pltpu.CompilerParams(
            dimension_semantics=("parallel",),              # megacore on v7x
        ),
        cost_estimate=pl.CostEstimate(
            flops=flops, transcendentals=0, bytes_accessed=bytes_accessed),
    )(x32, w1, b1f, w2, b2f, w3, b3f)

    if b_p != B:
        out = out[:B]
    return out


def init_linear(key, fan_in, fan_out):
    """Deterministic init mimicking PyTorch nn.Linear default (uniform +/- 1/sqrt(fan_in)).
    Weight stored pre-transposed as (in, out)."""
    kw, kb = jax.random.split(key)
    bound = 1.0 / jnp.sqrt(float(fan_in))
    w = jax.random.uniform(kw, (fan_in, fan_out), jnp.float32, -bound, bound)
    b = jax.random.uniform(kb, (1, fan_out), jnp.float32, -bound, bound)
    return w, b


def _reference_forward(x, w1, b1, w2, b2, w3, b3, compute_dtype):
    """Pure-JAX reference emulating the kernel's mixed precision."""
    def mm(a, w):
        return jnp.dot(a.astype(compute_dtype), w.astype(compute_dtype),
                       preferred_element_type=jnp.float32)
    h1 = jnp.maximum(mm(x, w1) + b1, 0.0)
    h2 = jnp.maximum(mm(h1, w2) + b2, 0.0)
    return mm(h2, w3) + b3


if __name__ == "__main__":
    # Module hyperparameters (note: original code sets fc1_dims = fc2_dims).
    input_dims = (8,)
    fc1_dims = 32   # mirrors the module's self.fc1_dims = fc2_dims
    fc2_dims = 32
    n_actions = 4
    batch = 2

    key = jax.random.PRNGKey(0)
    k_x, k1, k2, k3 = jax.random.split(key, 4)

    x = jax.random.normal(k_x, (batch, input_dims[0]), jnp.float32)
    w1, b1 = init_linear(k1, input_dims[0], fc1_dims)
    w2, b2 = init_linear(k2, fc1_dims, fc2_dims)
    w3, b3 = init_linear(k3, fc2_dims, n_actions)

    # One-time param prep (bf16 weights), then the cheap per-call forward.
    params = prepare_params(w1, b1, w2, b2, w3, b3)

    out = policy_network_forward(x, *params)
    out = jax.block_until_ready(out)
    assert out.shape == (batch, n_actions)

    # Check against a mixed-precision (bf16 matmul, f32 accumulate) reference.
    ref_bf16 = _reference_forward(x, w1, b1, w2, b2, w3, b3, jnp.bfloat16)
    assert jnp.allclose(out, ref_bf16, atol=1e-3, rtol=1e-3), \
        f"max abs err vs bf16 ref: {jnp.max(jnp.abs(out - ref_bf16))}"

    # Loose sanity check against a pure-f32 reference.
    ref_f32 = _reference_forward(x, w1, b1, w2, b2, w3, b3, jnp.float32)
    assert jnp.allclose(out, ref_f32, atol=5e-2, rtol=5e-2), \
        f"max abs err vs f32 ref: {jnp.max(jnp.abs(out - ref_f32))}"

    # Larger, non-tile-aligned batch: exercises adaptive tiling + >=2 grid steps
    # (megacore path on v7x) and the row-padding/slice path.
    big_B = 1037
    xb = jax.random.normal(jax.random.PRNGKey(1), (big_B, input_dims[0]), jnp.float32)
    out_big = jax.block_until_ready(policy_network_forward(xb, *params))
    assert out_big.shape == (big_B, n_actions)
    ref_big = _reference_forward(xb, w1, b1, w2, b2, w3, b3, jnp.bfloat16)
    assert jnp.allclose(out_big, ref_big, atol=1e-3, rtol=1e-3), \
        f"max abs err (big batch) vs bf16 ref: {jnp.max(jnp.abs(out_big - ref_big))}"

    print("KERNEL_OK")
</pallas_src>

<mosaic_0001>
module attributes {stable_mosaic.version = 11 : i64} {
  func.func @policy_mlp_kernel(%arg0: i32, %arg1: memref<8x8xf32, #tpu.memory_space<vmem>>, %arg2: memref<8x32xbf16, #tpu.memory_space<vmem>>, %arg3: memref<1x32xf32, #tpu.memory_space<vmem>>, %arg4: memref<32x32xbf16, #tpu.memory_space<vmem>>, %arg5: memref<1x32xf32, #tpu.memory_space<vmem>>, %arg6: memref<32x4xbf16, #tpu.memory_space<vmem>>, %arg7: memref<1x4xf32, #tpu.memory_space<vmem>>, %arg8: memref<8x4xf32, #tpu.memory_space<vmem>>) attributes {dimension_semantics = [#tpu.dimension_semantics<parallel>], iteration_bounds = array<i64: 1>, scalar_prefetch = 0 : i64, scratch_operands = 0 : i64, tpu.core_type = #tpu.core_type<tc>, window_params = [{transform_indices = @transform_0, window_bounds = array<i64: 8, 8>}, {pipeline_mode = #tpu.pipeline_mode<synchronous>, transform_indices = @transform_1, window_bounds = array<i64: 8, 32>}, {pipeline_mode = #tpu.pipeline_mode<synchronous>, transform_indices = @transform_2, window_bounds = array<i64: 1, 32>}, {pipeline_mode = #tpu.pipeline_mode<synchronous>, transform_indices = @transform_3, window_bounds = array<i64: 32, 32>}, {pipeline_mode = #tpu.pipeline_mode<synchronous>, transform_indices = @transform_4, window_bounds = array<i64: 1, 32>}, {pipeline_mode = #tpu.pipeline_mode<synchronous>, transform_indices = @transform_5, window_bounds = array<i64: 32, 4>}, {pipeline_mode = #tpu.pipeline_mode<synchronous>, transform_indices = @transform_6, window_bounds = array<i64: 1, 4>}, {transform_indices = @transform_7, window_bounds = array<i64: 8, 4>}]} {
    %c0 = arith.constant 0 : index
    %c0_0 = arith.constant 0 : index
    %0 = vector.load %arg1[%c0, %c0_0] : memref<8x8xf32, #tpu.memory_space<vmem>>, vector<8x8xf32>
    %1 = arith.truncf %0 : vector<8x8xf32> to vector<8x8xbf16>
    %c0_1 = arith.constant 0 : index
    %c0_2 = arith.constant 0 : index
    %2 = vector.load %arg2[%c0_1, %c0_2] : memref<8x32xbf16, #tpu.memory_space<vmem>>, vector<8x32xbf16>
    %cst = arith.constant dense<0.000000e+00> : vector<8x32xf32>
    %3 = tpu.matmul %1, %2, %cst {dimension_numbers = #tpu.dot_dimension_numbers<[1], [0], [0], [1], [0, 0, 1, 1], [], []>} : vector<8x8xbf16>, vector<8x32xbf16>, vector<8x32xf32> -> vector<8x32xf32>
    %c0_3 = arith.constant 0 : index
    %c0_4 = arith.constant 0 : index
    %4 = vector.load %arg3[%c0_3, %c0_4] : memref<1x32xf32, #tpu.memory_space<vmem>>, vector<1x32xf32>
    %5 = vector.broadcast %4 : vector<1x32xf32> to vector<8x32xf32>
    %6 = arith.addf %3, %5 : vector<8x32xf32>
    %cst_5 = arith.constant 0.000000e+00 : f32
    %7 = vector.broadcast %cst_5 : f32 to vector<8x32xf32>
    %8 = arith.maximumf %6, %7 : vector<8x32xf32>
    %9 = arith.truncf %8 : vector<8x32xf32> to vector<8x32xbf16>
    %c0_6 = arith.constant 0 : index
    %c0_7 = arith.constant 0 : index
    %10 = vector.load %arg4[%c0_6, %c0_7] : memref<32x32xbf16, #tpu.memory_space<vmem>>, vector<32x32xbf16>
    %cst_8 = arith.constant dense<0.000000e+00> : vector<8x32xf32>
    %11 = tpu.matmul %9, %10, %cst_8 {dimension_numbers = #tpu.dot_dimension_numbers<[1], [0], [0], [1], [0, 0, 1, 1], [], []>} : vector<8x32xbf16>, vector<32x32xbf16>, vector<8x32xf32> -> vector<8x32xf32>
    %c0_9 = arith.constant 0 : index
    %c0_10 = arith.constant 0 : index
    %12 = vector.load %arg5[%c0_9, %c0_10] : memref<1x32xf32, #tpu.memory_space<vmem>>, vector<1x32xf32>
    %13 = vector.broadcast %12 : vector<1x32xf32> to vector<8x32xf32>
    %14 = arith.addf %11, %13 : vector<8x32xf32>
    %cst_11 = arith.constant 0.000000e+00 : f32
    %15 = vector.broadcast %cst_11 : f32 to vector<8x32xf32>
    %16 = arith.maximumf %14, %15 : vector<8x32xf32>
    %17 = arith.truncf %16 : vector<8x32xf32> to vector<8x32xbf16>
    %c0_12 = arith.constant 0 : index
    %c0_13 = arith.constant 0 : index
    %18 = vector.load %arg6[%c0_12, %c0_13] : memref<32x4xbf16, #tpu.memory_space<vmem>>, vector<32x4xbf16>
    %cst_14 = arith.constant dense<0.000000e+00> : vector<8x4xf32>
    %19 = tpu.matmul %17, %18, %cst_14 {dimension_numbers = #tpu.dot_dimension_numbers<[1], [0], [0], [1], [0, 0, 1, 1], [], []>} : vector<8x32xbf16>, vector<32x4xbf16>, vector<8x4xf32> -> vector<8x4xf32>
    %c0_15 = arith.constant 0 : index
    %c0_16 = arith.constant 0 : index
    %20 = vector.load %arg7[%c0_15, %c0_16] : memref<1x4xf32, #tpu.memory_space<vmem>>, vector<1x4xf32>
    %21 = vector.broadcast %20 : vector<1x4xf32> to vector<8x4xf32>
    %22 = arith.addf %19, %21 : vector<8x4xf32>
    %c0_17 = arith.constant 0 : index
    %c0_18 = arith.constant 0 : index
    %23 = vector.load %arg8[%c0_17, %c0_18] : memref<8x4xf32, #tpu.memory_space<vmem>>, vector<8x4xf32>
    tpu.vector_store %arg8[%c0_17, %c0_18], %22 {strides = array<i32>} : memref<8x4xf32, #tpu.memory_space<vmem>>, vector<8x4xf32>,
    return
  }
  func.func @transform_0(%arg0: i32) -> (i32, i32) {
    %c0_i32 = arith.constant 0 : i32
    %c0_i32_0 = arith.constant 0 : i32
    return %arg0, %c0_i32 : i32, i32
  }
  func.func @transform_1(%arg0: i32) -> (i32, i32) {
    %c0_i32 = arith.constant 0 : i32
    %c0_i32_0 = arith.constant 0 : i32
    %c0_i32_1 = arith.constant 0 : i32
    return %c0_i32, %c0_i32_0 : i32, i32
  }
  func.func @transform_2(%arg0: i32) -> (i32, i32) {
    %c0_i32 = arith.constant 0 : i32
    %c0_i32_0 = arith.constant 0 : i32
    %c0_i32_1 = arith.constant 0 : i32
    return %c0_i32, %c0_i32_0 : i32, i32
  }
  func.func @transform_3(%arg0: i32) -> (i32, i32) {
    %c0_i32 = arith.constant 0 : i32
    %c0_i32_0 = arith.constant 0 : i32
    %c0_i32_1 = arith.constant 0 : i32
    return %c0_i32, %c0_i32_0 : i32, i32
  }
  func.func @transform_4(%arg0: i32) -> (i32, i32) {
    %c0_i32 = arith.constant 0 : i32
    %c0_i32_0 = arith.constant 0 : i32
    %c0_i32_1 = arith.constant 0 : i32
    return %c0_i32, %c0_i32_0 : i32, i32
  }
  func.func @transform_5(%arg0: i32) -> (i32, i32) {
    %c0_i32 = arith.constant 0 : i32
    %c0_i32_0 = arith.constant 0 : i32
    %c0_i32_1 = arith.constant 0 : i32
    return %c0_i32, %c0_i32_0 : i32, i32
  }
  func.func @transform_6(%arg0: i32) -> (i32, i32) {
    %c0_i32 = arith.constant 0 : i32
    %c0_i32_0 = arith.constant 0 : i32
    %c0_i32_1 = arith.constant 0 : i32
    return %c0_i32, %c0_i32_0 : i32, i32
  }
  func.func @transform_7(%arg0: i32) -> (i32, i32) {
    %c0_i32 = arith.constant 0 : i32
    %c0_i32_0 = arith.constant 0 : i32
    return %arg0, %c0_i32 : i32, i32
  }
}

</mosaic_0001>

<bundles_post_ra>
// kernel: policy_network_forward.1
= control target key start
LH: loop header
LB: loop body
LE: loop exit
PB: predicated region body
PF: predicated region fallthrough
CT: control target
= control target key end

     0   :  { %vm41_vm0 = vcmask 1043456   ;;  %v274_v0 = vmov 0.0   ;;  %vm275_vm1 = vmmov 0   ;;  %vm37_vm2 = vcmask 64512   ;;  %s346_s1 = inlined_call_operand.vmem [shape: bf16[8,32], index: 1, kind: input, shape index: {}]   ;;  %s347_s0 = inlined_call_operand.vmem [shape: f32[8,8], index: 0, kind: input, shape index: {}]   ;;  %s348_s3 = inlined_call_operand.vmem [shape: bf16[32,32], index: 3, kind: input, shape index: {}]   ;;  %s349_s5 = inlined_call_operand.vmem [shape: bf16[32,4], index: 5, kind: input, shape index: {}]   ;;  %s350_s2 = inlined_call_operand.vmem [shape: f32[1,32], index: 2, kind: input, shape index: {}]   ;;  %s351_s4 = inlined_call_operand.vmem [shape: f32[1,32], index: 4, kind: input, shape index: {}]   ;;  %s352_s6 = inlined_call_operand.vmem [shape: f32[1,4], index: 6, kind: input, shape index: {}]   ;;  %s353_s7 = inlined_call_operand.vmem [shape: f32[8,4], index: 7, kind: output, shape index: {}]  }
   0x1   :  { %246 = vmatprep.subr.bf16.mxu0 %v274_v0  ;;  %v29_v1 = vld [vmem:[%s346_s1] sm:$0xf]  ;;  %248 = vmatprep.mubr.msk.bf16.mxu0 %vm275_vm1, %v274_v0  ;;  %v271_v6 = vld [vmem:[%s348_s3 + $0x8] sm:$0xff]   ;;  %vm110_vm3 = vcmask 261120   ;;  %vm222_vm4 = vcmask 31744  }
   0x2   :  { %v27_v2 = vld [vmem:[%s347_s0] sm:$0xff]  ;;  %v43_v3 = vsel %vm41_vm0, %v29_v1, 0  ;;  %252 = vmatprep.subr.bf16.mxu1 %v274_v0  ;;  %256 = vmatprep.mubr.msk.bf16.mxu1 %vm275_vm1, %v274_v0  ;;  %v273_v16 = vld [vmem:[%s349_s5 + $0x8] sm:$0xff]  }
   0x3   :  { %v28_v4 = vpack.c.bf16 %v27_v2, %v27_v2  ;;  %247 = vmatpush3.bf16.msra.mxu0 %v43_v3  ;;  %v270_v5 = vld [vmem:[%s348_s3] sm:$0xff]  }
   0x4   :  { %260 = vmatprep.subr.bf16.mxu0 %v274_v0  ;;  %253 = vmatpush3.bf16.msra.mxu1 %v270_v5  ;;  %v272_v7 = vld [vmem:[%s349_s5] sm:$0xff]  }
   0x5   :  { %254 = vmatprep.subr.bf16.mxu1 %v274_v0  ;;  %v228_v8 = vld [vmem:[%s350_s2] ss:$0 sm:$0xff] }
   0x6   :  { %249 = vmatmul.mubr.msk.bf16.vlgmr.msra.gmra.mrb[0].mxu0 %vm37_vm2, %v28_v4  ;;  %v230_v17 = vld [vmem:[%s351_s4] ss:$0 sm:$0xff] }
   0x7   :  { %264 = vmatprep.mubr.msk.bf16.mxu0 %vm275_vm1, %v274_v0  ;;  %261 = vmatpush3.bf16.msra.mxu0 %v272_v7  ;;  %v234_v25 = vld [vmem:[%s352_s6] ss:$0 sm:$0xff] }
   0x8   :  { %255 = vmatpush3.bf16.msra.mxu1 %v271_v6  ;;  %262 = vmatprep.subr.bf16.mxu0 %v274_v0 }
   0xb   :  { %263 = vmatpush3.bf16.msra.mxu0 %v273_v16 }
  0xd9   :  { %v79_v9 = vpop.f32.mrb[0].mxu0 }
  0xda   :  { %v80_v10 = vadd.f32 %v228_v8, %v79_v9  ;;  %v250_v11 = vpop.f32.mrb[1].mxu0 }
  0xdb   :  { %v82_v12 = vpop.f32.mrb[2].mxu0 }
  0xdc   :  { %v85_v13 = vmax.f32 %v80_v10, 0.0  ;;  %v251_v14 = vpop.f32.mrb[3].mxu0 }
  0xde   :  { %v86_v15 = vpack.c.bf16 %v85_v13, %v85_v13 }
  0xe0   :  { %257 = vmatmul.mubr.msk.bf16.vlgmr.msra.gmra.mrb[0].mxu1 %vm110_vm3, %v86_v15 }
 0x1b3   :  { %v148_v18 = vpop.f32.mrb[0].mxu1 }
 0x1b4   :  { %v149_v19 = vadd.f32 %v230_v17, %v148_v18  ;;  %v258_v20 = vpop.f32.mrb[1].mxu1 }
 0x1b5   :  { %v151_v21 = vpop.f32.mrb[2].mxu1 }
 0x1b6   :  { %v154_v22 = vmax.f32 %v149_v19, 0.0  ;;  %v259_v23 = vpop.f32.mrb[3].mxu1 }
 0x1b8   :  { %v155_v24 = vpack.c.bf16 %v154_v22, %v154_v22 }
 0x1ba   :  { %265 = vmatmul.mubr.msk.bf16.vlgmr.msra.gmra.mrb[4].mxu0 %vm110_vm3, %v155_v24 }
 0x28d   :  { %v216_v26 = vpop.f32.mrb[4].mxu0 }
 0x28e   :  { %v217_v27 = vadd.f32 %v234_v25, %v216_v26  ;;  %v266_v28 = vpop.f32.mrb[5].mxu0 }
 0x28f   :  { %v219_v29 = vpop.f32.mrb[6].mxu0 }
 0x290   :  { %223 = vst.msk [vmem:[%s353_s7] sm:$0xff] %vm222_vm4, %v217_v27  ;;  %v267_v30 = vpop.f32.mrb[7].mxu0 }

</bundles_post_ra>
